<compile_context>
chip_gen: v6e
topology: v6e:2x2x1
jax: 0.10.0
libtpu: 0.0.40
codegen_flags: <defaults>
</compile_context>

<pallas_src>
import functools

import jax
import jax.numpy as jnp
from jax.experimental import pallas as pl
from jax.experimental.pallas import tpu as pltpu

# ---------------------------------------------------------------------------
# Synthetic, deterministic "model config" (PROJECT_CFG)
# ---------------------------------------------------------------------------
POINT_CLOUD_RANGE = (0.0, -25.6, -2.0, 51.2, 25.6, 4.0)   # xmin ymin zmin xmax ymax zmax
VOXEL_SIZE = (3.2, 3.2, 6.0)                               # vx vy vz

X_MIN, Y_MIN, Z_MIN, X_MAX, Y_MAX, Z_MAX = POINT_CLOUD_RANGE
VX, VY, VZ = VOXEL_SIZE
NX = int(round((X_MAX - X_MIN) / VX))   # BEV width  (W2) = 16
NY = int(round((Y_MAX - Y_MIN) / VY))   # BEV height (H2) = 16
NV = NX * NY                            # flat BEV cells = 256


# ---------------------------------------------------------------------------
# Pallas kernel
# ---------------------------------------------------------------------------
def _range_to_bev_kernel(pts_ref, mask_ref, feat_ref, out_ref, acc_ref):
    """Grid = (B, C_blocks, N_blocks).  Axis 2 reduces over point blocks."""
    p = pl.program_id(2)

    @pl.when(p == 0)
    def _():
        acc_ref[...] = jnp.zeros_like(acc_ref)

    pts = pts_ref[0]          # (Cp, Np) lane-dense rows: x, y, z, (intensity)
    mask = mask_ref[0]        # (1, Np)
    feat = feat_ref[0]        # (Cb, Np) channel-major features

    x = pts[0:1, :]           # (1, Np)
    y = pts[1:2, :]
    z = pts[2:3, :]

    ix = jnp.floor((x - X_MIN) / VX).astype(jnp.int32)   # (1, Np)
    iy = jnp.floor((y - Y_MIN) / VY).astype(jnp.int32)   # (1, Np)

    valid = (
        (mask > 0.0)
        & (ix >= 0) & (ix < NX)
        & (iy >= 0) & (iy < NY)
        & (z >= Z_MIN) & (z < Z_MAX)
    )                                                    # (1, Np) bool
    flat = jnp.where(valid, iy * NX + ix, -1)            # (1, Np); -1 never hits

    # Transposed one-hot (NV, Np) built by broadcast-compare only — no
    # relayout/transpose of `flat` is needed.  0/1 values, exact in f32.
    iota_col = jax.lax.broadcasted_iota(jnp.int32, (NV, 1), 0)
    onehot_t = (flat == iota_col).astype(jnp.float32)    # (NV, Np)

    # (Cb, NV) += feat (Cb, Np) · onehot_t (NV, Np)^T  — contract over points
    # (same q·k^T contraction shape the MXU handles in attention kernels).
    acc_ref[...] += jax.lax.dot_general(
        feat, onehot_t,
        dimension_numbers=(((1,), (1,)), ((), ())),
        preferred_element_type=jnp.float32)

    @pl.when(p == pl.num_programs(2) - 1)
    def _():
        out_ref[0] = acc_ref[...]                        # single HBM writeback


# ---------------------------------------------------------------------------
# Wrapper (pure reshapes only — no transposes — then pallas_call)
# ---------------------------------------------------------------------------
def _round_up(a, b):
    return (a + b - 1) // b * b


@functools.partial(jax.jit, static_argnames=("np_block", "c_block"))
def range_to_bev(fv_features, points_img, proj_masks, *, np_block=512, c_block=None):
    B, C, H, W = fv_features.shape
    Cp = points_img.shape[1]                 # typically 4: x, y, z, intensity
    N = H * W

    # Lane-dense, transpose-free layouts (pure reshapes of the NCHW inputs).
    feat = fv_features.reshape(B, C, N).astype(jnp.float32)      # (B, C, N)
    pts = points_img.reshape(B, Cp, N).astype(jnp.float32)       # (B, Cp, N)
    mask = proj_masks.reshape(B, 1, N).astype(jnp.float32)       # (B, 1, N)

    # Point-block size: multiple of 128; >= 256 fills the v6e/v7x MXU depth.
    np_block = max(128, min(_round_up(np_block, 128), _round_up(N, 128)))
    n_pad = (-N) % np_block
    if n_pad:
        # Padded tail points get mask == 0, so they contribute nothing.
        feat = jnp.pad(feat, ((0, 0), (0, 0), (0, n_pad)))
        pts = jnp.pad(pts, ((0, 0), (0, 0), (0, n_pad)))
        mask = jnp.pad(mask, ((0, 0), (0, 0), (0, n_pad)))
    n_total = N + n_pad

    # Optional channel split: a second "parallel" axis so both v7x TensorCores
    # stay busy even when B == 1.  Default: no split.
    cb = C if c_block is None else c_block
    assert C % cb == 0 and (cb == C or cb % 8 == 0)

    grid = (B, C // cb, n_total // np_block)

    out = pl.pallas_call(
        _range_to_bev_kernel,
        out_shape=jax.ShapeDtypeStruct((B, C, NV), jnp.float32),
        grid_spec=pltpu.PrefetchScalarGridSpec(
            num_scalar_prefetch=0,
            grid=grid,
            in_specs=[
                pl.BlockSpec((1, Cp, np_block), lambda b, c, p: (b, 0, p)),
                pl.BlockSpec((1, 1, np_block), lambda b, c, p: (b, 0, p)),
                pl.BlockSpec((1, cb, np_block), lambda b, c, p: (b, c, p)),
            ],
            out_specs=pl.BlockSpec((1, cb, NV), lambda b, c, p: (b, c, 0)),
            scratch_shapes=[pltpu.VMEM((cb, NV), jnp.float32)],
        ),
        compiler_params=pltpu.CompilerParams(
            dimension_semantics=("parallel", "parallel", "arbitrary")),
    )(pts, mask, feat)

    return out.reshape(B, C, NY, NX)         # (B, C, H2, W2) — NCHW like PyTorch


# ---------------------------------------------------------------------------
# Pure-JAX reference (forward_v1 semantics with a scatter-add projector)
# ---------------------------------------------------------------------------
def reference(fv_features, points_img, proj_masks):
    B, C, H, W = fv_features.shape
    N = H * W
    feat = jnp.transpose(fv_features, (0, 2, 3, 1)).reshape(B, N, C)
    pts = jnp.transpose(points_img[:, :3], (0, 2, 3, 1)).reshape(B, N, 3)
    m = proj_masks.reshape(B, N)
    outs = []
    for b in range(B):
        x, y, z = pts[b, :, 0], pts[b, :, 1], pts[b, :, 2]
        ix = jnp.floor((x - X_MIN) / VX).astype(jnp.int32)
        iy = jnp.floor((y - Y_MIN) / VY).astype(jnp.int32)
        valid = (
            (m[b] > 0)
            & (ix >= 0) & (ix < NX) & (iy >= 0) & (iy < NY)
            & (z >= Z_MIN) & (z < Z_MAX)
        )
        flat = jnp.where(valid, iy * NX + ix, NV)   # invalid -> dropped row
        grid = jnp.zeros((NV + 1, C), jnp.float32).at[flat].add(
            jnp.where(valid[:, None], feat[b], 0.0))
        outs.append(grid[:NV].T.reshape(C, NY, NX))
    return jnp.stack(outs, axis=0)


# ---------------------------------------------------------------------------
if __name__ == "__main__":
    key = jax.random.PRNGKey(0)
    k1, k2, k3, k4, k5 = jax.random.split(key, 5)

    B, C, H, W = 2, 16, 16, 32   # small shapes; N = H*W = 512

    fv_features = jax.random.normal(k1, (B, C, H, W), dtype=jnp.float32)

    px = jax.random.uniform(k2, (B, 1, H, W), minval=-5.0, maxval=56.0)
    py = jax.random.uniform(k3, (B, 1, H, W), minval=-30.0, maxval=30.0)
    pz = jax.random.uniform(k4, (B, 1, H, W), minval=-3.0, maxval=5.0)
    intensity = jnp.zeros((B, 1, H, W), jnp.float32)
    points_img = jnp.concatenate([px, py, pz, intensity], axis=1)  # (B, 4, H, W)

    proj_masks = (jax.random.uniform(k5, (B, H, W)) > 0.3).astype(jnp.float32)

    bev = range_to_bev(fv_features, points_img, proj_masks)
    jax.block_until_ready(bev)

    ref = reference(fv_features, points_img, proj_masks)
    assert bev.shape == (B, C, NY, NX)
    assert jnp.allclose(bev, ref, atol=1e-4, rtol=1e-4), "mismatch vs reference"

    print("KERNEL_OK")
</pallas_src>

<mosaic_0001>
module attributes {stable_mosaic.version = 11 : i64} {
  func.func @_range_to_bev_kernel(%arg0: i32, %arg1: i32, %arg2: i32, %arg3: memref<1x4x512xf32, #tpu.memory_space<vmem>>, %arg4: memref<1x1x512xf32, #tpu.memory_space<vmem>>, %arg5: memref<1x16x512xf32, #tpu.memory_space<vmem>>, %arg6: memref<1x16x256xf32, #tpu.memory_space<vmem>>, %arg7: memref<16x256xf32, #tpu.memory_space<vmem>>) attributes {dimension_semantics = [#tpu.dimension_semantics<parallel>, #tpu.dimension_semantics<parallel>, #tpu.dimension_semantics<arbitrary>], iteration_bounds = array<i64: 2, 1, 1>, scalar_prefetch = 0 : i64, scratch_operands = 1 : i64, tpu.core_type = #tpu.core_type<tc>, window_params = [{transform_indices = @transform_0, window_bounds = array<i64: 1, 4, 512>}, {transform_indices = @transform_1, window_bounds = array<i64: 1, 1, 512>}, {transform_indices = @transform_2, window_bounds = array<i64: 1, 16, 512>}, {transform_indices = @transform_3, window_bounds = array<i64: 1, 16, 256>}]} {
    %c0_i32 = arith.constant 0 : i32
    %0 = arith.cmpi eq, %arg2, %c0_i32 : i32
    %1 = arith.extui %0 : i1 to i32
    %c0_i32_0 = arith.constant 0 : i32
    %2 = arith.cmpi ne, %1, %c0_i32_0 : i32
    scf.if %2 {
      %cst_26 = arith.constant 0.000000e+00 : f32
      %62 = vector.broadcast %cst_26 : f32 to vector<16x256xf32>
      %c0_27 = arith.constant 0 : index
      %c0_28 = arith.constant 0 : index
      %63 = vector.load %arg7[%c0_27, %c0_28] : memref<16x256xf32, #tpu.memory_space<vmem>>, vector<16x256xf32>
      tpu.vector_store %arg7[%c0_27, %c0_28], %62 {strides = array<i32>} : memref<16x256xf32, #tpu.memory_space<vmem>>, vector<16x256xf32>,
    } else {
    }
    %c0 = arith.constant 0 : index
    %c0_1 = arith.constant 0 : index
    %c0_2 = arith.constant 0 : index
    %3 = vector.load %arg3[%c0, %c0_1, %c0_2] : memref<1x4x512xf32, #tpu.memory_space<vmem>>, vector<1x4x512xf32>
    %4 = vector.shape_cast %3 : vector<1x4x512xf32> to vector<4x512xf32>
    %c0_3 = arith.constant 0 : index
    %c0_4 = arith.constant 0 : index
    %c0_5 = arith.constant 0 : index
    %5 = vector.load %arg4[%c0_3, %c0_4, %c0_5] : memref<1x1x512xf32, #tpu.memory_space<vmem>>, vector<1x1x512xf32>
    %6 = vector.shape_cast %5 : vector<1x1x512xf32> to vector<1x512xf32>
    %c0_6 = arith.constant 0 : index
    %c0_7 = arith.constant 0 : index
    %c0_8 = arith.constant 0 : index
    %7 = vector.load %arg5[%c0_6, %c0_7, %c0_8] : memref<1x16x512xf32, #tpu.memory_space<vmem>>, vector<1x16x512xf32>
    %8 = vector.shape_cast %7 : vector<1x16x512xf32> to vector<16x512xf32>
    %9 = vector.extract_strided_slice %4 {offsets = [0, 0], sizes = [1, 512], strides = [1, 1]} : vector<4x512xf32> to vector<1x512xf32>
    %10 = vector.extract_strided_slice %4 {offsets = [1, 0], sizes = [1, 512], strides = [1, 1]} : vector<4x512xf32> to vector<1x512xf32>
    %11 = vector.extract_strided_slice %4 {offsets = [2, 0], sizes = [1, 512], strides = [1, 1]} : vector<4x512xf32> to vector<1x512xf32>
    %cst = arith.constant 0.000000e+00 : f32
    %12 = vector.broadcast %cst : f32 to vector<1x512xf32>
    %13 = arith.subf %9, %12 : vector<1x512xf32>
    %cst_9 = arith.constant 3.200000e+00 : f32
    %14 = vector.broadcast %cst_9 : f32 to vector<1x512xf32>
    %15 = arith.divf %13, %14 : vector<1x512xf32>
    %16 = math.floor %15 : vector<1x512xf32>
    %17 = arith.fptosi %16 : vector<1x512xf32> to vector<1x512xi32>
    %cst_10 = arith.constant -2.560000e+01 : f32
    %18 = vector.broadcast %cst_10 : f32 to vector<1x512xf32>
    %19 = arith.subf %10, %18 : vector<1x512xf32>
    %cst_11 = arith.constant 3.200000e+00 : f32
    %20 = vector.broadcast %cst_11 : f32 to vector<1x512xf32>
    %21 = arith.divf %19, %20 : vector<1x512xf32>
    %22 = math.floor %21 : vector<1x512xf32>
    %23 = arith.fptosi %22 : vector<1x512xf32> to vector<1x512xi32>
    %cst_12 = arith.constant 0.000000e+00 : f32
    %24 = vector.broadcast %cst_12 : f32 to vector<1x512xf32>
    %25 = arith.cmpf ogt, %6, %24 : vector<1x512xf32>
    %c0_i32_13 = arith.constant 0 : i32
    %26 = vector.broadcast %c0_i32_13 : i32 to vector<1x512xi32>
    %27 = arith.cmpi sge, %17, %26 : vector<1x512xi32>
    %28 = arith.andi %25, %27 : vector<1x512xi1>
    %c16_i32 = arith.constant 16 : i32
    %29 = vector.broadcast %c16_i32 : i32 to vector<1x512xi32>
    %30 = arith.cmpi slt, %17, %29 : vector<1x512xi32>
    %31 = arith.andi %28, %30 : vector<1x512xi1>
    %c0_i32_14 = arith.constant 0 : i32
    %32 = vector.broadcast %c0_i32_14 : i32 to vector<1x512xi32>
    %33 = arith.cmpi sge, %23, %32 : vector<1x512xi32>
    %34 = arith.andi %31, %33 : vector<1x512xi1>
    %c16_i32_15 = arith.constant 16 : i32
    %35 = vector.broadcast %c16_i32_15 : i32 to vector<1x512xi32>
    %36 = arith.cmpi slt, %23, %35 : vector<1x512xi32>
    %37 = arith.andi %34, %36 : vector<1x512xi1>
    %cst_16 = arith.constant -2.000000e+00 : f32
    %38 = vector.broadcast %cst_16 : f32 to vector<1x512xf32>
    %39 = arith.cmpf oge, %11, %38 : vector<1x512xf32>
    %40 = arith.andi %37, %39 : vector<1x512xi1>
    %cst_17 = arith.constant 4.000000e+00 : f32
    %41 = vector.broadcast %cst_17 : f32 to vector<1x512xf32>
    %42 = arith.cmpf olt, %11, %41 : vector<1x512xf32>
    %43 = arith.andi %40, %42 : vector<1x512xi1>
    %c16_i32_18 = arith.constant 16 : i32
    %44 = vector.broadcast %c16_i32_18 : i32 to vector<1x512xi32>
    %45 = arith.muli %23, %44 : vector<1x512xi32>
    %46 = arith.addi %45, %17 : vector<1x512xi32>
    %c-1_i32 = arith.constant -1 : i32
    %47 = vector.broadcast %c-1_i32 : i32 to vector<1x512xi32>
    %48 = arith.select %43, %46, %47 : vector<1x512xi1>, vector<1x512xi32>
    %49 = tpu.iota {dimensions = array<i32: 0>} : vector<256x1xi32>
    %50 = vector.broadcast %48 : vector<1x512xi32> to vector<256x512xi32>
    %51 = vector.broadcast %49 : vector<256x1xi32> to vector<256x512xi32>
    %52 = arith.cmpi eq, %50, %51 : vector<256x512xi32>
    %53 = arith.extui %52 : vector<256x512xi1> to vector<256x512xi32>
    %54 = arith.sitofp %53 : vector<256x512xi32> to vector<256x512xf32>
    %c0_19 = arith.constant 0 : index
    %c0_20 = arith.constant 0 : index
    %55 = vector.load %arg7[%c0_19, %c0_20] : memref<16x256xf32, #tpu.memory_space<vmem>>, vector<16x256xf32>
    %cst_21 = arith.constant dense<0.000000e+00> : vector<16x256xf32>
    %56 = tpu.matmul %8, %54, %cst_21 {dimension_numbers = #tpu.dot_dimension_numbers<[1], [1], [0], [0], [0, 0, 1, 0], [], []>} : vector<16x512xf32>, vector<256x512xf32>, vector<16x256xf32> -> vector<16x256xf32>
    %57 = arith.addf %55, %56 : vector<16x256xf32>
    %c0_22 = arith.constant 0 : index
    %c0_23 = arith.constant 0 : index
    %58 = vector.load %arg7[%c0_22, %c0_23] : memref<16x256xf32, #tpu.memory_space<vmem>>, vector<16x256xf32>
    tpu.vector_store %arg7[%c0_22, %c0_23], %57 {strides = array<i32>} : memref<16x256xf32, #tpu.memory_space<vmem>>, vector<16x256xf32>,
    %c0_i32_24 = arith.constant 0 : i32
    %59 = arith.cmpi eq, %arg2, %c0_i32_24 : i32
    %60 = arith.extui %59 : i1 to i32
    %c0_i32_25 = arith.constant 0 : i32
    %61 = arith.cmpi ne, %60, %c0_i32_25 : i32
    scf.if %61 {
      %c0_26 = arith.constant 0 : index
      %c0_27 = arith.constant 0 : index
      %62 = vector.load %arg7[%c0_26, %c0_27] : memref<16x256xf32, #tpu.memory_space<vmem>>, vector<16x256xf32>
      %c0_28 = arith.constant 0 : index
      %c0_29 = arith.constant 0 : index
      %c0_30 = arith.constant 0 : index
      %63 = vector.load %arg6[%c0_28, %c0_29, %c0_30] : memref<1x16x256xf32, #tpu.memory_space<vmem>>, vector<1x16x256xf32>
      %64 = vector.shape_cast %63 : vector<1x16x256xf32> to vector<16x256xf32>
      %65 = vector.shape_cast %62 : vector<16x256xf32> to vector<1x16x256xf32>
      tpu.vector_store %arg6[%c0_28, %c0_29, %c0_30], %65 {strides = array<i32>} : memref<1x16x256xf32, #tpu.memory_space<vmem>>, vector<1x16x256xf32>,
    } else {
    }
    return
  }
  func.func @transform_0(%arg0: i32, %arg1: i32, %arg2: i32) -> (i32, i32, i32) {
    %c0_i32 = arith.constant 0 : i32
    %c0_i32_0 = arith.constant 0 : i32
    return %arg0, %c0_i32, %arg2 : i32, i32, i32
  }
  func.func @transform_1(%arg0: i32, %arg1: i32, %arg2: i32) -> (i32, i32, i32) {
    %c0_i32 = arith.constant 0 : i32
    %c0_i32_0 = arith.constant 0 : i32
    return %arg0, %c0_i32, %arg2 : i32, i32, i32
  }
  func.func @transform_2(%arg0: i32, %arg1: i32, %arg2: i32) -> (i32, i32, i32) {
    %c0_i32 = arith.constant 0 : i32
    return %arg0, %arg1, %arg2 : i32, i32, i32
  }
  func.func @transform_3(%arg0: i32, %arg1: i32, %arg2: i32) -> (i32, i32, i32) {
    %c0_i32 = arith.constant 0 : i32
    %c0_i32_0 = arith.constant 0 : i32
    return %arg0, %arg1, %c0_i32 : i32, i32, i32
  }
}

</mosaic_0001>

<bundles_post_ra>
// kernel: range_to_bev.1
= control target key start
LH: loop header
LB: loop body
LE: loop exit
PB: predicated region body
PF: predicated region fallthrough
CT: control target
= control target key end

     0   :  { %s1643_s12 = smov 0   ;;  %s1645_s13 = smov 0   ;;  %s2395_s0 = inlined_call_operand.vmem [shape: f32[2,4,512], index: 0, kind: input, shape index: {}]   ;;  %s2396_s1 = inlined_call_operand.vmem [shape: f32[2,1,512], index: 1, kind: input, shape index: {}]   ;;  %s2397_s2 = inlined_call_operand.vmem [shape: f32[2,16,512], index: 2, kind: input, shape index: {}]   ;;  %s2398_s3 = inlined_call_operand.vmem [shape: f32[2,16,256], index: 3, kind: output, shape index: {}]  }
   0x1   :  { %s1647_s14 = smov 0  }
   0x2 LB: > { %s32_s15 = sadd.s32 1, %s1614_s13  ;;  %p1290_p0 = scmp.ge.s32.totalorder %s1618_s14, 1  ;;  %s1618_s14 = sphi %s1647_s14, %s13_s14   ;;  %s1614_s13 = sphi %s1645_s13, %s2457_s13   ;;  %s1610_s12 = sphi %s1643_s12, %s2456_s12  }
   0x3   : > { %p34_p1 = scmp.ge.s32.totalorder %s32_s15, 2  ;;  %p206_p2 = scmp.lt.s32.totalorder %s1618_s14, 3 }
   0x5   : > { %s2459_s15 = smov (%p34_p1, %s32_s15), 0  ;;  %p207_p3 = pnand %p1290_p0, %p206_p2 }
   0x6   : > { %p262_p4 = scmp.lt.s32.totalorder (!%p207_p3), %s1610_s12, 1 }
   0x7   : > { %210 = sbr.rel (%p207_p3) target bundleno = 378 (0x17a), region = 32 }
   0xc   : > { %v349_v0 = vlaneseq  ;;  %v1620_v1 = vmov 1966171168   ;;  %s2461_s12 = smov (!%p262_p4, %s1610_s12), 1  ;;  %v1621_v16 = vmov 0  }
   0xd   : > { %v347_v2 = vunpack.c.l.s4 %v1620_v1  ;;  %s1558_s16 = sshll.u32 %s2461_s12, 4  ;;  %s1293_s20 = sshll.u32 %s2461_s12, 2 }
   0xe   : > { %v1664_v4 = vshrl.u32 %v349_v0, 7  ;;  %s269_s19 = scalar_lea.vmem %s2395_s0, %s1558_s16  ;;  %s278_s23 = scalar_lea.vmem %s2396_s1, %s1293_s20 }
   0xf   : > { %v348_v3 = vunpack.c.0.s8 %v347_v2  ;;  %v315_v5 = vld [vmem:[%s269_s19] sm:$0xff]  ;;  %v316_v6 = vld [vmem:[%s269_s19 + $0x8] sm:$0xff]  ;;  %s1559_s24 = sshll.u32 %s2461_s12, 6  ;;  %s1560_s28 = sshll.u32 %s2461_s12, 5 }
  0x10   : > { %v327_v7 = vmul.f32 0.3125, %v315_v5  ;;  %v328_v8 = vmul.f32 0.3125, %v316_v6  ;;  %v1298_v9 = vadd.f32 25.6, %v315_v5  ;;  %v1299_v10 = vadd.f32 25.6, %v316_v6  ;;  %s1716_s27 = scalar_lea.vmem %s2397_s2, %s1559_s24  ;;  %s305_s4 = scalar_lea.vmem %s2398_s3, %s1560_s28 }
  0x11   : > { %v1674_v11 = vsub.s32 %v348_v3, %v1664_v4  ;;  %vm454_vm0 = vcmp.ge.f32.partialorder %v315_v5, -2.0  ;;  %vm455_vm1 = vcmp.ge.f32.partialorder %v316_v6, -2.0  ;;  %vm483_vm2 = vcmp.lt.f32.partialorder %v315_v5, 4.0  ;;  %v317_v20 = vld [vmem:[%s278_s23] sm:$0xf] }
  0x12   : > { %v329_v12 = vfloor.f32 %v327_v7  ;;  %v330_v13 = vfloor.f32 %v328_v8  ;;  %v335_v14 = vmul.f32 0.3125, %v1298_v9  ;;  %v336_v15 = vmul.f32 0.3125, %v1299_v10 }
  0x13   : > { %v456_v17 = vsel %vm454_vm0, 1, %v1621_v16  ;;  %v457_v18 = vsel %vm455_vm1, 1, %v1621_v16  ;;  %vm484_vm3 = vcmp.lt.f32.partialorder %v316_v6, 4.0  ;;  %v485_v19 = vsel %vm483_vm2, 1, %v1621_v16 }
  0x14   : > { %v1561_v21 = vtrunc.f32 %v329_v12  ;;  %v1563_v22 = vtrunc.f32 %v330_v13  ;;  %v337_v23 = vfloor.f32 %v335_v14  ;;  %v338_v24 = vfloor.f32 %v336_v15 }
  0x15   : > { %v464_v25 = vrot.slane %v456_v17, %v1674_v11  ;;  %v471_v26 = vrot.slane %v457_v18, %v1674_v11  ;;  %v486_v27 = vsel %vm484_vm3, 1, %v1621_v16  ;;  %vm341_vm4 = vcmp.gt.f32.partialorder %v317_v20, 0.0 }
  0x16   : > { %v1562_v28 = vcvt.f32.s32 %v1561_v21  ;;  %v1564_v29 = vcvt.f32.s32 %v1563_v22  ;;  %v1565_v30 = vtrunc.f32 %v337_v23  ;;  %v1567_v31 = vtrunc.f32 %v338_v24 }
  0x17   : > { %v472_v32 = vcombine.low %v464_v25, %v471_v26  ;;  %v493_v33 = vrot.slane %v485_v19, %v1674_v11  ;;  %v500_v34 = vrot.slane %v486_v27, %v1674_v11  ;;  %v580_v13 = vsub.s32 1, %v1664_v4  ;;  %v319_v25 = vld [vmem:[%s1716_s27 + $0x8] sm:$0xff]  ;;  %v321_v27 = vld [vmem:[%s1716_s27 + $0x18] sm:$0xff] }
  0x18   : > { %v1566_v35 = vcvt.f32.s32 %v1565_v30  ;;  %v1568_v36 = vcvt.f32.s32 %v1567_v31  ;;  %vm342_vm5 = vcmp.ge.s32.totalorder %v1562_v28, 0  ;;  %vm343_vm6 = vcmp.ge.s32.totalorder %v1564_v29, 0  ;;  %1042 = vmatprep.mubr.f32.mxu0 %v319_v25  ;;  %1119 = vmatprep.mubr.f32.mxu1 %v321_v27 }
  0x19   : > { %v344_v37 = vsel %vm342_vm5, 1, %v1621_v16  ;;  %v345_v38 = vsel %vm343_vm6, 1, %v1621_v16  ;;  %vm370_vm7 = vcmp.lt.s32.totalorder %v1562_v28, 16  ;;  %vm371_vm8 = vcmp.lt.s32.totalorder %v1564_v29, 16 }
  0x1a   : > { %v352_v39 = vrot.slane %v344_v37, %v1674_v11  ;;  %v359_v40 = vrot.slane %v345_v38, %v1674_v11  ;;  %v372_v41 = vsel %vm370_vm7, 1, %v1621_v16  ;;  %v373_v42 = vsel %vm371_vm8, 1, %v1621_v16 }
  0x1b   : > { %v380_v43 = vrot.slane %v372_v41, %v1674_v11  ;;  %v387_v44 = vrot.slane %v373_v42, %v1674_v11  ;;  %vm398_vm9 = vcmp.ge.s32.totalorder %v1566_v35, 0  ;;  %vm399_vm10 = vcmp.ge.s32.totalorder %v1568_v36, 0 }
  0x1c   : > { %v360_v45 = vcombine.low %v352_v39, %v359_v40  ;;  %v400_v46 = vsel %vm398_vm9, 1, %v1621_v16  ;;  %v401_v47 = vsel %vm399_vm10, 1, %v1621_v16  ;;  %vm426_vm11 = vcmp.lt.s32.totalorder %v1566_v35, 16 }
  0x1d   : > { %v388_v48 = vcombine.low %v380_v43, %v387_v44  ;;  %v408_v49 = vrot.slane %v400_v46, %v1674_v11  ;;  %v415_v50 = vrot.slane %v401_v47, %v1674_v11  ;;  %vm427_vm12 = vcmp.lt.s32.totalorder %v1568_v36, 16 }
  0x1e   : > { %v367_v51 = vrot.slane %v360_v45, %v1674_v11  ;;  %v428_v52 = vsel %vm426_vm11, 1, %v1621_v16  ;;  %v429_v53 = vsel %vm427_vm12, 1, %v1621_v16  ;;  %v479_v54 = vrot.slane %v472_v32, %v1674_v11 }
  0x1f   : > { %v395_v55 = vrot.slane %v388_v48, %v1674_v11  ;;  %v416_v56 = vcombine.high %v408_v49, %v415_v50  ;;  %v436_v57 = vrot.slane %v428_v52, %v1674_v11  ;;  %v443_v58 = vrot.slane %v429_v53, %v1674_v11 }
  0x20   : > { %vm368_vm13 = vcmp.ne.s32.totalorder %v367_v51, 0  ;;  %v480_v59 = vcombine.high %v479_v54, %v479_v54  ;;  %v501_v60 = vcombine.low %v493_v33, %v500_v34  ;;  %v512_v61 = vmul.u32 16, %v1566_v35 }
  0x21   : > { %vm369_vm14 = vmand %vm341_vm4, %vm368_vm13  ;;  %vm396_vm15 = vcmp.ne.s32.totalorder %v395_v55, 0  ;;  %v423_v62 = vrot.slane %v416_v56, %v1674_v11  ;;  %v444_v63 = vcombine.high %v436_v57, %v443_v58  ;;  %v513_v0 = vmul.u32 16, %v1568_v36  ;;  %v320_v56 = vld [vmem:[%s1716_s27 + $0x10] sm:$0xff]  ;;  %v323_v57 = vld [vmem:[%s1716_s27 + $0x28] sm:$0xff] }
  0x22   : > { %vm397_vm0 = vmand %vm369_vm14, %vm396_vm15  ;;  %v508_v1 = vrot.slane %v501_v60, %v1674_v11  ;;  %v514_v2 = vrot.slane %v1562_v28, 7  ;;  %v515_v3 = vrot.slane %v1564_v29, 7  ;;  %vm481_vm3 = vcmp.ne.s32.totalorder %v480_v59, 0  ;;  %v325_v58 = vld [vmem:[%s1716_s27 + $0x38] sm:$0xff]  ;;  %v322_v59 = vld [vmem:[%s1716_s27 + $0x20] sm:$0xff] }
  0x23   : > { %vm424_vm1 = vcmp.ne.s32.totalorder %v423_v62, 0  ;;  %v451_v5 = vrot.slane %v444_v63, %v1674_v11  ;;  %v588_v14 = vsub.s32 3, %v1664_v4  ;;  %v576_v15 = vsub.s32 0, %v1664_v4  ;;  %v324_v60 = vld [vmem:[%s1716_s27 + $0x30] sm:$0xff] }
  0x24   : > { %vm425_vm2 = vmand %vm397_vm0, %vm424_vm1  ;;  %v509_v6 = vcombine.high %v508_v1, %v508_v1  ;;  %v516_v7 = vadd.s32 %v514_v2, %v512_v61  ;;  %v517_v8 = vadd.s32 %v515_v3, %v513_v0  ;;  %v584_v16 = vsub.s32 2, %v1664_v4 }
  0x25   : > { %vm452_vm5 = vcmp.ne.s32.totalorder %v451_v5, 0  ;;  %v557_v18 = vadd.s32 120, %v1664_v4  ;;  %v556_v20 = vadd.s32 112, %v1664_v4  ;;  %v1622_v26 = vmov 1.0  }
  0x26   : > { %vm453_vm4 = vmand %vm425_vm2, %vm452_vm5  ;;  %vm510_vm6 = vcmp.ne.s32.totalorder %v509_v6, 0  ;;  %v524_v9 = vrot.slane %v516_v7, %v1674_v11  ;;  %v531_v10 = vrot.slane %v517_v8, %v1674_v11  ;;  %v554_v28 = vadd.s32 96, %v1664_v4 }
  0x27   : > { %vm482_vm7 = vmand %vm453_vm4, %vm481_vm3  ;;  %v553_v29 = vadd.s32 88, %v1664_v4  ;;  %v552_v30 = vadd.s32 80, %v1664_v4  ;;  %v1757_v31 = vadd.s32 72, %v1664_v4  ;;  %v1760_v32 = vadd.s32 64, %v1664_v4 }
  0x28   : > { %v532_v12 = vcombine.high %v524_v9, %v531_v10  ;;  %vm511_vm8 = vmand %vm482_vm7, %vm510_vm6  ;;  %v1763_v33 = vadd.s32 56, %v1664_v4  ;;  %v1766_v34 = vadd.s32 48, %v1664_v4  ;;  %v1769_v35 = vadd.s32 40, %v1664_v4 }
  0x29   : > { %v1772_v36 = vadd.s32 248, %v1664_v4  ;;  %v1777_v37 = vadd.s32 240, %v1664_v4  ;;  %v1780_v38 = vadd.s32 232, %v1664_v4  ;;  %v1783_v39 = vadd.s32 224, %v1664_v4 }
  0x2a   : > { %v539_v17 = vrot.slane %v532_v12, %v1674_v11  ;;  %v555_v11 = vadd.s32 104, %v1664_v4  ;;  %v1786_v40 = vadd.s32 216, %v1664_v4  ;;  %v1793_v41 = vadd.s32 208, %v1664_v4 }
  0x2b   : > { %v1796_v42 = vadd.s32 200, %v1664_v4  ;;  %v1802_v43 = vadd.s32 192, %v1664_v4  ;;  %v1820_v44 = vadd.s32 184, %v1664_v4  ;;  %v1835_v45 = vadd.s32 176, %v1664_v4 }
  0x2c   : > { %v540_v19 = vsel %vm511_vm8, %v539_v17, 4294967295  ;;  %v1870_v46 = vadd.s32 168, %v1664_v4  ;;  %v1891_v47 = vadd.s32 160, %v1664_v4  ;;  %v1928_v48 = vadd.s32 152, %v1664_v4 }
  0x2d   : > { %v1705_v21 = vrot.slane %v540_v19, %v580_v13  ;;  %v1707_v22 = vrot.slane %v540_v19, %v588_v14  ;;  %v1709_v23 = vrot.slane %v540_v19, %v576_v15  ;;  %v1711_v24 = vrot.slane %v540_v19, %v584_v16 }
  0x2e   : > { %v1949_v49 = vadd.s32 144, %v1664_v4  ;;  %v1984_v50 = vadd.s32 136, %v1664_v4  ;;  %v2001_v51 = vadd.s32 128, %v1664_v4  ;;  %v546_v52 = vadd.s32 32, %v1664_v4 }
  0x2f   : > { %vm651_vm9 = vcmp.eq.s32.totalorder %v1705_v21, %v557_v18  ;;  %vm653_vm10 = vcmp.eq.s32.totalorder %v1707_v22, %v557_v18  ;;  %vm650_vm11 = vcmp.eq.s32.totalorder %v1709_v23, %v557_v18  ;;  %vm652_vm12 = vcmp.eq.s32.totalorder %v1711_v24, %v557_v18 }
  0x30   : > { %1428 = vmatprep.subr.msk.mxu0 %vm651_vm9, %v1622_v26  ;;  %1492 = vmatprep.subr.msk.mxu1 %vm653_vm10, %v1622_v26  ;;  %vm647_vm13 = vcmp.eq.s32.totalorder %v1705_v21, %v556_v20  ;;  %vm649_vm14 = vcmp.eq.s32.totalorder %v1707_v22, %v556_v20  ;;  %vm646_vm15 = vcmp.eq.s32.totalorder %v1709_v23, %v556_v20  ;;  %v545_v53 = vadd.s32 24, %v1664_v4 }
  0x31   : > { %1429 = vmatpush1.xpose.msk.msra.mxu0 %vm650_vm11, %v1622_v26  ;;  %1493 = vmatpush1.xpose.msk.msra.mxu1 %vm652_vm12, %v1622_v26  ;;  %vm648_vm0 = vcmp.eq.s32.totalorder %v1711_v24, %v556_v20  ;;  %vm643_vm1 = vcmp.eq.s32.totalorder %v1705_v21, %v555_v11  ;;  %vm645_vm2 = vcmp.eq.s32.totalorder %v1707_v22, %v555_v11  ;;  %v544_v54 = vadd.s32 16, %v1664_v4 }
  0x32   : > { %1430 = vmatprep.subr.msk.mxu0 %vm647_vm13, %v1622_v26  ;;  %1494 = vmatprep.subr.msk.mxu1 %vm649_vm14, %v1622_v26  ;;  %vm642_vm3 = vcmp.eq.s32.totalorder %v1709_v23, %v555_v11  ;;  %vm644_vm5 = vcmp.eq.s32.totalorder %v1711_v24, %v555_v11  ;;  %vm639_vm4 = vcmp.eq.s32.totalorder %v1705_v21, %v554_v28  ;;  %v543_v55 = vadd.s32 8, %v1664_v4 }
  0x33   : > { %vm641_vm6 = vcmp.eq.s32.totalorder %v1707_v22, %v554_v28  ;;  %vm638_vm7 = vcmp.eq.s32.totalorder %v1709_v23, %v554_v28  ;;  %vm640_vm8 = vcmp.eq.s32.totalorder %v1711_v24, %v554_v28  ;;  %vm635_vm9 = vcmp.eq.s32.totalorder %v1705_v21, %v553_v29 }
  0x34   : > { %vm637_vm10 = vcmp.eq.s32.totalorder %v1707_v22, %v553_v29  ;;  %vm634_vm11 = vcmp.eq.s32.totalorder %v1709_v23, %v553_v29  ;;  %vm636_vm12 = vcmp.eq.s32.totalorder %v1711_v24, %v553_v29  ;;  %vm631_vm13 = vcmp.eq.s32.totalorder %v1705_v21, %v552_v30 }
  0x35   : > { %1431 = vmatpush1.xpose.msk.msra.mxu0 %vm646_vm15, %v1622_v26  ;;  %1495 = vmatpush1.xpose.msk.msra.mxu1 %vm648_vm0, %v1622_v26  ;;  %vm633_vm14 = vcmp.eq.s32.totalorder %v1707_v22, %v552_v30  ;;  %vm630_vm15 = vcmp.eq.s32.totalorder %v1709_v23, %v552_v30  ;;  %vm632_vm0 = vcmp.eq.s32.totalorder %v1711_v24, %v552_v30 }
  0x36   : > { %1432 = vmatprep.subr.msk.mxu0 %vm643_vm1, %v1622_v26  ;;  %1496 = vmatprep.subr.msk.mxu1 %vm645_vm2, %v1622_v26  ;;  %vm627_vm1 = vcmp.eq.s32.totalorder %v1705_v21, %v1757_v31  ;;  %vm629_vm2 = vcmp.eq.s32.totalorder %v1707_v22, %v1757_v31 }
  0x39   : > { %1433 = vmatpush1.xpose.msk.msra.mxu0 %vm642_vm3, %v1622_v26  ;;  %1497 = vmatpush1.xpose.msk.msra.mxu1 %vm644_vm5, %v1622_v26  ;;  %vm626_vm3 = vcmp.eq.s32.totalorder %v1709_v23, %v1757_v31  ;;  %vm628_vm5 = vcmp.eq.s32.totalorder %v1711_v24, %v1757_v31 }
  0x3a   : > { %1434 = vmatprep.subr.msk.mxu0 %vm639_vm4, %v1622_v26  ;;  %1498 = vmatprep.subr.msk.mxu1 %vm641_vm6, %v1622_v26  ;;  %vm623_vm4 = vcmp.eq.s32.totalorder %v1705_v21, %v1760_v32  ;;  %vm625_vm6 = vcmp.eq.s32.totalorder %v1707_v22, %v1760_v32 }
  0x3d   : > { %1435 = vmatpush1.xpose.msk.msra.mxu0 %vm638_vm7, %v1622_v26  ;;  %1499 = vmatpush1.xpose.msk.msra.mxu1 %vm640_vm8, %v1622_v26  ;;  %vm622_vm7 = vcmp.eq.s32.totalorder %v1709_v23, %v1760_v32  ;;  %vm617_vm8 = vcmp.eq.s32.totalorder %v1707_v22, %v1766_v34 }
  0x3e   : > { %1436 = vmatprep.subr.msk.mxu0 %vm635_vm9, %v1622_v26  ;;  %1500 = vmatprep.subr.msk.mxu1 %vm637_vm10, %v1622_v26  ;;  %vm2399_vm10 = vcmp.eq.s32.totalorder %v1711_v24, %v1760_v32  ;;  %vm605_vm9 = vcmp.eq.s32.totalorder %v1707_v22, %v545_v53 }
  0x41   : > { %1437 = vmatpush1.xpose.msk.msra.mxu0 %vm634_vm11, %v1622_v26  ;;  %1501 = vmatpush1.xpose.msk.msra.mxu1 %vm636_vm12, %v1622_v26  ;;  %vm667_vm11 = vcmp.eq.s32.totalorder %v1705_v21, %v1928_v48  ;;  %vm613_vm12 = vcmp.eq.s32.totalorder %v1707_v22, %v1769_v35 }
  0x42   : > { %1438 = vmatprep.subr.msk.mxu0 %vm631_vm13, %v1622_v26  ;;  %1502 = vmatprep.subr.msk.mxu1 %vm633_vm14, %v1622_v26  ;;  %vm695_vm13 = vcmp.eq.s32.totalorder %v1705_v21, %v1793_v41  ;;  %vm682_vm14 = vcmp.eq.s32.totalorder %v1709_v23, %v1820_v44 }
  0x45   : > { %1439 = vmatpush1.xpose.msk.msra.mxu0 %vm630_vm15, %v1622_v26  ;;  %1503 = vmatpush1.xpose.msk.msra.mxu1 %vm632_vm0, %v1622_v26  ;;  %vm618_vm15 = vcmp.eq.s32.totalorder %v1709_v23, %v1763_v33  ;;  %vm620_vm0 = vcmp.eq.s32.totalorder %v1711_v24, %v1763_v33 }
  0x46   : > { %1440 = vmatprep.subr.msk.mxu0 %vm627_vm1, %v1622_v26  ;;  %1504 = vmatprep.subr.msk.mxu1 %vm629_vm2, %v1622_v26  ;;  %vm615_vm2 = vcmp.eq.s32.totalorder %v1705_v21, %v1766_v34  ;;  %vm610_vm1 = vcmp.eq.s32.totalorder %v1709_v23, %v1769_v35 }
  0x49   : > { %1441 = vmatpush1.xpose.msk.msra.mxu0 %vm626_vm3, %v1622_v26  ;;  %1505 = vmatpush1.xpose.msk.msra.mxu1 %vm628_vm5, %v1622_v26  ;;  %vm614_vm3 = vcmp.eq.s32.totalorder %v1709_v23, %v1766_v34  ;;  %vm616_vm5 = vcmp.eq.s32.totalorder %v1711_v24, %v1766_v34 }
  0x4a   : > { %1442 = vmatprep.subr.msk.mxu0 %vm623_vm4, %v1622_v26  ;;  %1506 = vmatprep.subr.msk.mxu1 %vm625_vm6, %v1622_v26  ;;  %vm611_vm6 = vcmp.eq.s32.totalorder %v1705_v21, %v1769_v35  ;;  %vm666_vm4 = vcmp.eq.s32.totalorder %v1709_v23, %v1928_v48 }
  0x4d   : > { %1443 = vmatpush1.xpose.msk.msra.mxu0 %vm622_vm7, %v1622_v26  ;;  %1507 = vmatpush1.xpose.msk.msra.mxu1 %vm2399_vm10, %v1622_v26  ;;  %vm2400_vm7 = vcmp.eq.s32.totalorder %v1705_v21, %v1763_v33  ;;  %vm2401_vm10 = vcmp.eq.s32.totalorder %v1707_v22, %v1763_v33 }
  0x4e   : > { %1444 = vmatprep.subr.msk.mxu0 %vm2400_vm7, %v1622_v26  ;;  %1508 = vmatprep.subr.msk.mxu1 %vm2401_vm10, %v1622_v26  ;;  %vm669_vm10 = vcmp.eq.s32.totalorder %v1707_v22, %v1928_v48  ;;  %vm662_vm7 = vcmp.eq.s32.totalorder %v1709_v23, %v1949_v49 }
  0x51   : > { %1445 = vmatpush1.xpose.msk.msra.mxu0 %vm618_vm15, %v1622_v26  ;;  %1509 = vmatpush1.xpose.msk.msra.mxu1 %vm620_vm0, %v1622_v26  ;;  %vm658_vm15 = vcmp.eq.s32.totalorder %v1709_v23, %v1984_v50  ;;  %vm660_vm0 = vcmp.eq.s32.totalorder %v1711_v24, %v1984_v50 }
  0x52   : > { %1446 = vmatprep.subr.msk.mxu0 %vm615_vm2, %v1622_v26  ;;  %1510 = vmatprep.subr.msk.mxu1 %vm617_vm8, %v1622_v26  ;;  %vm612_vm8 = vcmp.eq.s32.totalorder %v1711_v24, %v1769_v35  ;;  %vm609_vm2 = vcmp.eq.s32.totalorder %v1707_v22, %v546_v52 }
  0x55   : > { %1447 = vmatpush1.xpose.msk.msra.mxu0 %vm614_vm3, %v1622_v26  ;;  %1511 = vmatpush1.xpose.msk.msra.mxu1 %vm616_vm5, %v1622_v26  ;;  %vm607_vm3 = vcmp.eq.s32.totalorder %v1705_v21, %v546_v52  ;;  %vm608_vm5 = vcmp.eq.s32.totalorder %v1711_v24, %v546_v52 }
  0x56   : > { %1448 = vmatprep.subr.msk.mxu0 %vm611_vm6, %v1622_v26  ;;  %1512 = vmatprep.subr.msk.mxu1 %vm613_vm12, %v1622_v26  ;;  %vm606_vm12 = vcmp.eq.s32.totalorder %v1709_v23, %v546_v52  ;;  %vm603_vm6 = vcmp.eq.s32.totalorder %v1705_v21, %v545_v53 }
  0x59   : > { %1449 = vmatpush1.xpose.msk.msra.mxu0 %vm610_vm1, %v1622_v26  ;;  %1513 = vmatpush1.xpose.msk.msra.mxu1 %vm612_vm8, %v1622_v26  ;;  %vm602_vm1 = vcmp.eq.s32.totalorder %v1709_v23, %v545_v53  ;;  %vm599_vm8 = vcmp.eq.s32.totalorder %v1705_v21, %v544_v54 }
  0x5a   : > { %1450 = vmatprep.subr.msk.mxu0 %vm607_vm3, %v1622_v26  ;;  %1514 = vmatprep.subr.msk.mxu1 %vm609_vm2, %v1622_v26  ;;  %vm604_vm2 = vcmp.eq.s32.totalorder %v1711_v24, %v545_v53  ;;  %vm601_vm3 = vcmp.eq.s32.totalorder %v1707_v22, %v544_v54 }
  0x5d   : > { %1451 = vmatpush1.xpose.msk.msra.mxu0 %vm606_vm12, %v1622_v26  ;;  %1515 = vmatpush1.xpose.msk.msra.mxu1 %vm608_vm5, %v1622_v26  ;;  %vm600_vm12 = vcmp.eq.s32.totalorder %v1711_v24, %v544_v54  ;;  %vm595_vm5 = vcmp.eq.s32.totalorder %v1705_v21, %v543_v55 }
  0x5e   : > { %1452 = vmatprep.subr.msk.mxu0 %vm603_vm6, %v1622_v26  ;;  %1516 = vmatprep.subr.msk.mxu1 %vm605_vm9, %v1622_v26  ;;  %vm598_vm9 = vcmp.eq.s32.totalorder %v1709_v23, %v544_v54  ;;  %vm597_vm6 = vcmp.eq.s32.totalorder %v1707_v22, %v543_v55 }
  0x61   : > { %1453 = vmatpush1.xpose.msk.msra.mxu0 %vm602_vm1, %v1622_v26  ;;  %1517 = vmatpush1.xpose.msk.msra.mxu1 %vm604_vm2, %v1622_v26  ;;  %vm594_vm1 = vcmp.eq.s32.totalorder %v1709_v23, %v543_v55  ;;  %vm596_vm2 = vcmp.eq.s32.totalorder %v1711_v24, %v543_v55 }
  0x62   : > { %1454 = vmatprep.subr.msk.mxu0 %vm599_vm8, %v1622_v26  ;;  %1518 = vmatprep.subr.msk.mxu1 %vm601_vm3, %v1622_v26  ;;  %vm591_vm8 = vcmp.eq.s32.totalorder %v1705_v21, %v1664_v4  ;;  %vm593_vm3 = vcmp.eq.s32.totalorder %v1707_v22, %v1664_v4 }
  0x65   : > { %1455 = vmatpush1.xpose.msk.msra.mxu0 %vm598_vm9, %v1622_v26  ;;  %1519 = vmatpush1.xpose.msk.msra.mxu1 %vm600_vm12, %v1622_v26  ;;  %vm590_vm9 = vcmp.eq.s32.totalorder %v1709_v23, %v1664_v4  ;;  %vm592_vm12 = vcmp.eq.s32.totalorder %v1711_v24, %v1664_v4  ;;  %v318_v4 = vld [vmem:[%s1716_s27] sm:$0xff] }
  0x66   : > { %1456 = vmatprep.subr.msk.mxu0 %vm595_vm5, %v1622_v26  ;;  %1520 = vmatprep.subr.msk.mxu1 %vm597_vm6, %v1622_v26  ;;  %vm715_vm5 = vcmp.eq.s32.totalorder %v1705_v21, %v1772_v36  ;;  %vm717_vm6 = vcmp.eq.s32.totalorder %v1707_v22, %v1772_v36 }
  0x69   : > { %1457 = vmatpush1.xpose.msk.msra.mxu0 %vm594_vm1, %v1622_v26  ;;  %1521 = vmatpush1.xpose.msk.msra.mxu1 %vm596_vm2, %v1622_v26  ;;  %vm2402_vm1 = vcmp.eq.s32.totalorder %v1709_v23, %v1772_v36  ;;  %vm2403_vm2 = vcmp.eq.s32.totalorder %v1711_v24, %v1772_v36 }
  0x6a   : > { %1458 = vmatprep.subr.msk.mxu0 %vm591_vm8, %v1622_v26  ;;  %1522 = vmatprep.subr.msk.mxu1 %vm593_vm3, %v1622_v26  ;;  %vm2404_vm8 = vcmp.eq.s32.totalorder %v1705_v21, %v1777_v37  ;;  %vm2405_vm3 = vcmp.eq.s32.totalorder %v1707_v22, %v1777_v37 }
  0x6d   : > { %1459 = vmatpush1.xpose.msk.msra.mxu0 %vm590_vm9, %v1622_v26  ;;  %1523 = vmatpush1.xpose.msk.msra.mxu1 %vm592_vm12, %v1622_v26  ;;  %vm2406_vm9 = vcmp.eq.s32.totalorder %v1709_v23, %v1777_v37  ;;  %vm2407_vm12 = vcmp.eq.s32.totalorder %v1711_v24, %v1777_v37 }
  0x6e   : > { %1460 = vmatprep.subr.msk.mxu0 %vm715_vm5, %v1622_v26  ;;  %1524 = vmatprep.subr.msk.mxu1 %vm717_vm6, %v1622_v26  ;;  %vm2408_vm5 = vcmp.eq.s32.totalorder %v1705_v21, %v1780_v38  ;;  %vm2409_vm6 = vcmp.eq.s32.totalorder %v1707_v22, %v1780_v38 }
  0x71   : > { %1461 = vmatpush2.xpose.msk.msra.mxu0 %vm2402_vm1, %v1622_v26  ;;  %1525 = vmatpush2.xpose.msk.msra.mxu1 %vm2403_vm2, %v1622_v26  ;;  %vm2410_vm1 = vcmp.eq.s32.totalorder %v1709_v23, %v1780_v38  ;;  %vm2411_vm2 = vcmp.eq.s32.totalorder %v1711_v24, %v1780_v38 }
  0x72   : > { %1462 = vmatprep.subr.msk.mxu0 %vm2404_vm8, %v1622_v26  ;;  %1526 = vmatprep.subr.msk.mxu1 %vm2405_vm3, %v1622_v26  ;;  %vm2412_vm8 = vcmp.eq.s32.totalorder %v1705_v21, %v1783_v39  ;;  %vm2413_vm3 = vcmp.eq.s32.totalorder %v1707_v22, %v1783_v39 }
  0x75   : > { %1463 = vmatpush2.xpose.msk.msra.mxu0 %vm2406_vm9, %v1622_v26  ;;  %1527 = vmatpush2.xpose.msk.msra.mxu1 %vm2407_vm12, %v1622_v26  ;;  %vm2414_vm9 = vcmp.eq.s32.totalorder %v1709_v23, %v1783_v39  ;;  %vm2415_vm12 = vcmp.eq.s32.totalorder %v1711_v24, %v1783_v39 }
  0x76   : > { %1464 = vmatprep.subr.msk.mxu0 %vm2408_vm5, %v1622_v26  ;;  %1528 = vmatprep.subr.msk.mxu1 %vm2409_vm6, %v1622_v26  ;;  %vm2416_vm5 = vcmp.eq.s32.totalorder %v1705_v21, %v1786_v40  ;;  %vm2417_vm6 = vcmp.eq.s32.totalorder %v1707_v22, %v1786_v40 }
  0x79   : > { %1465 = vmatpush2.xpose.msk.msra.mxu0 %vm2410_vm1, %v1622_v26  ;;  %1529 = vmatpush2.xpose.msk.msra.mxu1 %vm2411_vm2, %v1622_v26  ;;  %vm2418_vm1 = vcmp.eq.s32.totalorder %v1709_v23, %v1786_v40  ;;  %vm2419_vm2 = vcmp.eq.s32.totalorder %v1711_v24, %v1786_v40 }
  0x7a   : > { %1466 = vmatprep.subr.msk.mxu0 %vm2412_vm8, %v1622_v26  ;;  %1530 = vmatprep.subr.msk.mxu1 %vm2413_vm3, %v1622_v26  ;;  %vm2420_vm8 = vcmp.eq.s32.totalorder %v1707_v22, %v1793_v41  ;;  %vm2421_vm3 = vcmp.eq.s32.totalorder %v1709_v23, %v1793_v41 }
  0x7d   : > { %1467 = vmatpush2.xpose.msk.msra.mxu0 %vm2414_vm9, %v1622_v26  ;;  %1531 = vmatpush2.xpose.msk.msra.mxu1 %vm2415_vm12, %v1622_v26  ;;  %vm2422_vm9 = vcmp.eq.s32.totalorder %v1711_v24, %v1793_v41  ;;  %vm2423_vm12 = vcmp.eq.s32.totalorder %v1705_v21, %v1796_v42 }
  0x7e   : > { %1468 = vmatprep.subr.msk.mxu0 %vm2416_vm5, %v1622_v26  ;;  %1532 = vmatprep.subr.msk.mxu1 %vm2417_vm6, %v1622_v26  ;;  %vm2425_vm5 = vcmp.eq.s32.totalorder %v1709_v23, %v1796_v42  ;;  %vm2426_vm6 = vcmp.eq.s32.totalorder %v1711_v24, %v1796_v42 }
  0x81   : > { %1469 = vmatpush2.xpose.msk.msra.mxu0 %vm2418_vm1, %v1622_v26  ;;  %1533 = vmatpush2.xpose.msk.msra.mxu1 %vm2419_vm2, %v1622_v26  ;;  %vm2427_vm1 = vcmp.eq.s32.totalorder %v1705_v21, %v1802_v43  ;;  %vm2428_vm2 = vcmp.eq.s32.totalorder %v1707_v22, %v1802_v43 }
  0x82   : > { %1470 = vmatprep.subr.msk.mxu0 %vm695_vm13, %v1622_v26  ;;  %1534 = vmatprep.subr.msk.mxu1 %vm2420_vm8, %v1622_v26  ;;  %vm2424_vm13 = vcmp.eq.s32.totalorder %v1707_v22, %v1796_v42  ;;  %vm2429_vm8 = vcmp.eq.s32.totalorder %v1709_v23, %v1802_v43 }
  0x85   : > { %1471 = vmatpush2.xpose.msk.msra.mxu0 %vm2421_vm3, %v1622_v26  ;;  %1535 = vmatpush2.xpose.msk.msra.mxu1 %vm2422_vm9, %v1622_v26  ;;  %vm2430_vm3 = vcmp.eq.s32.totalorder %v1711_v24, %v1802_v43  ;;  %vm2431_vm9 = vcmp.eq.s32.totalorder %v1705_v21, %v1820_v44 }
  0x86   : > { %1472 = vmatprep.subr.msk.mxu0 %vm2423_vm12, %v1622_v26  ;;  %1536 = vmatprep.subr.msk.mxu1 %vm2424_vm13, %v1622_v26  ;;  %vm2432_vm12 = vcmp.eq.s32.totalorder %v1707_v22, %v1820_v44  ;;  %vm2433_vm13 = vcmp.eq.s32.totalorder %v1711_v24, %v1820_v44 }
  0x89   : > { %1473 = vmatpush2.xpose.msk.msra.mxu0 %vm2425_vm5, %v1622_v26  ;;  %1537 = vmatpush2.xpose.msk.msra.mxu1 %vm2426_vm6, %v1622_v26  ;;  %vm2434_vm5 = vcmp.eq.s32.totalorder %v1705_v21, %v1835_v45  ;;  %vm2435_vm6 = vcmp.eq.s32.totalorder %v1707_v22, %v1835_v45 }
  0x8a   : > { %1474 = vmatprep.subr.msk.mxu0 %vm2427_vm1, %v1622_v26  ;;  %1538 = vmatprep.subr.msk.mxu1 %vm2428_vm2, %v1622_v26  ;;  %vm2436_vm1 = vcmp.eq.s32.totalorder %v1709_v23, %v1835_v45  ;;  %vm2438_vm2 = vcmp.eq.s32.totalorder %v1705_v21, %v1870_v46 }
  0x8d   : > { %1475 = vmatpush2.xpose.msk.msra.mxu0 %vm2429_vm8, %v1622_v26  ;;  %1539 = vmatpush2.xpose.msk.msra.mxu1 %vm2430_vm3, %v1622_v26  ;;  %vm2439_vm8 = vcmp.eq.s32.totalorder %v1707_v22, %v1870_v46  ;;  %vm2440_vm3 = vcmp.eq.s32.totalorder %v1709_v23, %v1870_v46 }
  0x8e   : > { %1476 = vmatprep.subr.msk.mxu0 %vm2431_vm9, %v1622_v26  ;;  %1540 = vmatprep.subr.msk.mxu1 %vm2432_vm12, %v1622_v26  ;;  %vm2441_vm9 = vcmp.eq.s32.totalorder %v1711_v24, %v1870_v46  ;;  %vm2442_vm12 = vcmp.eq.s32.totalorder %v1705_v21, %v1891_v47 }
  0x91   : > { %1477 = vmatpush2.xpose.msk.msra.mxu0 %vm682_vm14, %v1622_v26  ;;  %1541 = vmatpush2.xpose.msk.msra.mxu1 %vm2433_vm13, %v1622_v26  ;;  %vm2437_vm14 = vcmp.eq.s32.totalorder %v1711_v24, %v1835_v45  ;;  %vm2443_vm13 = vcmp.eq.s32.totalorder %v1707_v22, %v1891_v47 }
  0x92   : > { %1478 = vmatprep.subr.msk.mxu0 %vm2434_vm5, %v1622_v26  ;;  %1542 = vmatprep.subr.msk.mxu1 %vm2435_vm6, %v1622_v26  ;;  %vm2444_vm5 = vcmp.eq.s32.totalorder %v1709_v23, %v1891_v47  ;;  %vm2445_vm6 = vcmp.eq.s32.totalorder %v1711_v24, %v1891_v47 }
  0x95   : > { %1479 = vmatpush2.xpose.msk.msra.mxu0 %vm2436_vm1, %v1622_v26  ;;  %1543 = vmatpush2.xpose.msk.msra.mxu1 %vm2437_vm14, %v1622_v26  ;;  %vm2446_vm1 = vcmp.eq.s32.totalorder %v1711_v24, %v1928_v48  ;;  %vm2450_vm14 = vcmp.eq.s32.totalorder %v1705_v21, %v1984_v50 }
  0x96   : > { %1480 = vmatprep.subr.msk.mxu0 %vm2438_vm2, %v1622_v26  ;;  %1544 = vmatprep.subr.msk.mxu1 %vm2439_vm8, %v1622_v26  ;;  %vm2451_vm2 = vcmp.eq.s32.totalorder %v1707_v22, %v1984_v50  ;;  %vm2453_vm8 = vcmp.eq.s32.totalorder %v1707_v22, %v2001_v51 }
  0x99   : > { %1481 = vmatpush2.xpose.msk.msra.mxu0 %vm2440_vm3, %v1622_v26  ;;  %1545 = vmatpush2.xpose.msk.msra.mxu1 %vm2441_vm9, %v1622_v26 }
  0x9a   : > { %1482 = vmatprep.subr.msk.mxu0 %vm2442_vm12, %v1622_v26  ;;  %1546 = vmatprep.subr.msk.mxu1 %vm2443_vm13, %v1622_v26 }
  0x9d   : > { %1483 = vmatpush2.xpose.msk.msra.mxu0 %vm2444_vm5, %v1622_v26  ;;  %1547 = vmatpush2.xpose.msk.msra.mxu1 %vm2445_vm6, %v1622_v26 }
  0x9e   : > { %1484 = vmatprep.subr.msk.mxu0 %vm667_vm11, %v1622_v26  ;;  %1548 = vmatprep.subr.msk.mxu1 %vm669_vm10, %v1622_v26  ;;  %vm2447_vm11 = vcmp.eq.s32.totalorder %v1705_v21, %v1949_v49  ;;  %vm2448_vm10 = vcmp.eq.s32.totalorder %v1707_v22, %v1949_v49 }
  0xa1   : > { %1485 = vmatpush2.xpose.msk.msra.mxu0 %vm666_vm4, %v1622_v26  ;;  %1549 = vmatpush2.xpose.msk.msra.mxu1 %vm2446_vm1, %v1622_v26  ;;  %vm2449_vm4 = vcmp.eq.s32.totalorder %v1711_v24, %v1949_v49 }
  0xa2   : > { %1486 = vmatprep.subr.msk.mxu0 %vm2447_vm11, %v1622_v26  ;;  %1550 = vmatprep.subr.msk.mxu1 %vm2448_vm10, %v1622_v26 }
  0xa5   : > { %1487 = vmatpush2.xpose.msk.msra.mxu0 %vm662_vm7, %v1622_v26  ;;  %1551 = vmatpush2.xpose.msk.msra.mxu1 %vm2449_vm4, %v1622_v26  ;;  %vm2452_vm7 = vcmp.eq.s32.totalorder %v1705_v21, %v2001_v51 }
  0xa6   : > { %1488 = vmatprep.subr.msk.mxu0 %vm2450_vm14, %v1622_v26  ;;  %1552 = vmatprep.subr.msk.mxu1 %vm2451_vm2, %v1622_v26 }
  0xa9   : > { %1489 = vmatpush2.xpose.msk.msra.mxu0 %vm658_vm15, %v1622_v26  ;;  %1553 = vmatpush2.xpose.msk.msra.mxu1 %vm660_vm0, %v1622_v26  ;;  %vm2454_vm15 = vcmp.eq.s32.totalorder %v1709_v23, %v2001_v51  ;;  %vm2455_vm0 = vcmp.eq.s32.totalorder %v1711_v24, %v2001_v51 }
  0xaa   : > { %1490 = vmatprep.subr.msk.mxu0 %vm2452_vm7, %v1622_v26  ;;  %1554 = vmatprep.subr.msk.mxu1 %vm2453_vm8, %v1622_v26 }
  0xad   : > { %1491 = vmatpush2.xpose.msk.msra.mxu0 %vm2454_vm15, %v1622_v26  ;;  %1555 = vmatpush2.xpose.msk.msra.mxu1 %vm2455_vm0, %v1622_v26 }
  0xb0   : > { %1043 = vmatmul.mubr.f32.vlgmr.msra.gmra.mxu0 %v318_v4  ;;  %1120 = vmatmul.mubr.f32.vlgmr.msra.gmra.mxu1 %v320_v56 }
  0xb1   : > { %1048 = vmatprep.mubr.f32.mxu0 %v323_v57  ;;  %1125 = vmatprep.mubr.f32.mxu1 %v325_v58 }
  0xb4   : > { %1049 = vmatmul.mubr.f32.gmra.mxu0 %v322_v59  ;;  %1126 = vmatmul.mubr.f32.gmra.mxu1 %v324_v60 }
 0x170   : > { %v1044_v61 = vpop.f32.mrf.mxu0  ;;  %v1121_v62 = vpop.f32.mrf.mxu1 }
 0x171   : > { %v1122_v63 = vadd.f32 %v1121_v62, %v1044_v61 }
 0x172   : > { %v1046_v0 = vpop.f32.mrf.mxu0  ;;  %v1123_v1 = vpop.f32.mrf.mxu1 }
 0x173   : > { %1147 = vst [vmem:[%s305_s4] sm:$0xff] %v1122_v63  ;;  %v1124_v2 = vadd.f32 %v1123_v1, %v1046_v0 }
 0x174   : > { %v1050_v3 = vpop.f32.mrf.mxu0  ;;  %v1127_v5 = vpop.f32.mrf.mxu1 }
 0x175   : > { %1148 = vst [vmem:[%s305_s4 + $0x8] sm:$0xff] %v1124_v2  ;;  %v1128_v6 = vadd.f32 %v1127_v5, %v1050_v3 }
 0x176   : > { %v1052_v7 = vpop.f32.mrf.mxu0  ;;  %v1129_v8 = vpop.f32.mrf.mxu1 }
 0x177   : > { %1149 = vst [vmem:[%s305_s4 + $0x10] sm:$0xff] %v1128_v6  ;;  %v1130_v9 = vadd.f32 %v1129_v8, %v1052_v7 }
 0x179   : > { %1150 = vst [vmem:[%s305_s4 + $0x18] sm:$0xff] %v1130_v9 }
 0x17a PF: > { %s13_s14 = sadd.s32 1, %s1618_s14   ;;  %s2456_s12 = smov %s1614_s13 }
 0x17b   : > { %p10_p5 = scmp.ge.s32.totalorder %s13_s14, 4   ;;  %s2457_s13 = smov %s2459_s15 }
 0x17d   :  { %12 = sbr.rel (!%p10_p5) target bundleno = 2 (0x2), region = 76 }

</bundles_post_ra>
